<compile_context>
chip_gen: v6e
topology: v6e:2x2x1
jax: 0.10.0
libtpu: 0.0.40
codegen_flags: <defaults>
</compile_context>

<pallas_src>
import functools

import jax
import jax.numpy as jnp
from jax.experimental import pallas as pl
from jax.experimental.pallas import tpu as pltpu

_LANES = 128     # vreg lane width  -> columns padded to a multiple of 128
_SUBLANES = 8    # vreg sublane depth -> batch rows padded to a multiple of 8


def _round_up(x, m):
    return ((x + m - 1) // m) * m


def _default_num_core_splits():
    # v7x has 2 TensorCores per chip (a "parallel" grid axis shards across
    # them); v5e / v6e have a single TC, where an extra core-split axis is
    # pure overhead (second accumulator init + host-side reduction).
    try:
        kind = jax.devices()[0].device_kind.lower()
    except Exception:
        return 1
    return 2 if ("v7" in kind or "tpu7" in kind) else 1


def _pairwise_ranking_loss_kernel(scores_ref, labels_ref, loss_ref, cnt_ref,
                                  loss_acc, cnt_acc, *, margin, n_valid,
                                  b_valid, tiles_per_split):
    """One grid step: one (bt, Np) batch tile, pairwise sweep via lane rotation."""
    c = pl.program_id(0)                      # core split        ("parallel")
    i = pl.program_id(1)                      # batch tile index  ("arbitrary")
    n_steps = pl.num_programs(1)

    # Zero this core's resident accumulators on its first sequential step.
    @pl.when(i == 0)
    def _init():
        loss_acc[...] = jnp.zeros_like(loss_acc)
        cnt_acc[...] = jnp.zeros_like(cnt_acc)

    bt, n_pad = scores_ref.shape
    s = scores_ref[...]                       # (bt, Np) f32, lane-dense
    lab = labels_ref[...]                     # (bt, Np) i32
    s_m = s + margin                          # hoisted: hinge = max(s_m - s_rot, 0)

    # Validity of the un-rotated side: global batch row < B and lane j < N.
    row0 = (c * tiles_per_split + i) * bt
    row_ids = jax.lax.broadcasted_iota(jnp.int32, (bt, n_pad), 0) + row0
    col_ids = jax.lax.broadcasted_iota(jnp.int32, (bt, n_pad), 1)
    base_valid = (row_ids < b_valid) & (col_ids < n_valid)

    def body(_, carry):
        s_rot, l_rot, cid_rot = carry
        # After d cumulative rotations, lane j holds partner column cid_rot[j];
        # rolling cid_rot with the same op keeps the pairing consistent with
        # the hardware rotate direction (each ordered pair is hit exactly once
        # over the n_pad iterations; d == 0 pairs j with itself -> mask False).
        pair_mask = (lab != l_rot) & base_valid & (cid_rot < n_valid)
        hinge = jnp.maximum(s_m - s_rot, 0.0)
        loss_acc[...] = loss_acc[...] + jnp.where(pair_mask, hinge, 0.0)
        cnt_acc[...] = cnt_acc[...] + pair_mask.astype(jnp.float32)
        # Static shift=1 lane rotations (XLU slot; overlaps the VPU chain).
        return (pltpu.roll(s_rot, shift=1, axis=1),
                pltpu.roll(l_rot, shift=1, axis=1),
                pltpu.roll(cid_rot, shift=1, axis=1))

    jax.lax.fori_loop(0, n_pad, body, (s, lab, col_ids))

    # Single scalar reduce per core, once, in the epilogue.
    @pl.when(i == n_steps - 1)
    def _fin():
        loss_ref[...] = jnp.broadcast_to(jnp.sum(loss_acc[...]), loss_ref.shape)
        cnt_ref[...] = jnp.broadcast_to(jnp.sum(cnt_acc[...]), cnt_ref.shape)


def pairwise_ranking_loss(scores, labels, margin=1.0, *, batch_tile=32,
                          num_core_splits=None):
    """Pallas implementation of PairwiseRankingLoss.forward(scores, labels)."""
    scores = jnp.asarray(scores, jnp.float32)
    labels = jnp.asarray(labels, jnp.int32)
    if scores.ndim != 2 or scores.shape != labels.shape:
        raise ValueError(
            f"scores/labels must be matching 2-D arrays, got {scores.shape} / {labels.shape}")
    b, n = scores.shape
    if b != n:
        # TODO(synk): torch's unsqueeze/expand only broadcasts for square scores
        # (or degenerate B==1 / N==1 shapes); only the square contract is implemented.
        raise ValueError(f"PairwiseRankingLoss requires square scores, got {scores.shape}")

    if num_core_splits is None:
        num_core_splits = _default_num_core_splits()

    n_pad = _round_up(n, _LANES)

    # Batch rows per grid step: large enough to amortise the per-step overhead,
    # small enough that the rotate carries + accumulators stay inside the vreg
    # file and the VMEM footprint stays flat for very large N.
    bytes_per_row = n_pad * 4
    max_rows = max(_SUBLANES, (16 * 1024 * 1024) // (10 * bytes_per_row))
    bt = min(int(batch_tile), max_rows, _round_up(b, _SUBLANES))
    bt = max(_SUBLANES, (bt // _SUBLANES) * _SUBLANES)

    tiles = -(-b // bt)
    num_core_splits = max(1, min(int(num_core_splits), tiles))
    tiles_per_split = -(-tiles // num_core_splits)
    b_pad = num_core_splits * tiles_per_split * bt

    # Cheap wrapper-side padding of the raw (B, N) data (no 3-D broadcast views).
    scores_p = jnp.zeros((b_pad, n_pad), jnp.float32).at[:b, :n].set(scores)
    labels_p = jnp.zeros((b_pad, n_pad), jnp.int32).at[:b, :n].set(labels)

    kernel = functools.partial(
        _pairwise_ranking_loss_kernel, margin=float(margin), n_valid=n,
        b_valid=b, tiles_per_split=tiles_per_split)

    in_map = lambda c, i: (c * tiles_per_split + i, 0)
    out_map = lambda c, i: (c, 0, 0)

    loss_parts, cnt_parts = pl.pallas_call(
        kernel,
        grid=(num_core_splits, tiles_per_split),
        in_specs=[pl.BlockSpec((bt, n_pad), in_map),
                  pl.BlockSpec((bt, n_pad), in_map)],
        out_specs=(pl.BlockSpec((1, 1, 1), out_map),
                   pl.BlockSpec((1, 1, 1), out_map)),
        out_shape=(jax.ShapeDtypeStruct((num_core_splits, 1, 1), jnp.float32),
                   jax.ShapeDtypeStruct((num_core_splits, 1, 1), jnp.float32)),
        scratch_shapes=[pltpu.VMEM((bt, n_pad), jnp.float32),
                        pltpu.VMEM((bt, n_pad), jnp.float32)],
        compiler_params=pltpu.CompilerParams(
            dimension_semantics=("parallel", "arbitrary"),
            vmem_limit_bytes=32 * 1024 * 1024),
    )(scores_p, labels_p)

    # Combine per-core partial sums.  Division by zero (all labels equal)
    # yields NaN exactly like the torch reference.
    return jnp.sum(loss_parts) / jnp.sum(cnt_parts)


def _reference(scores, labels, margin=1.0):
    # Pure-JAX reference mirroring the torch code exactly (square case).
    mask = (labels[:, None, :] != labels[:, :, None]).astype(jnp.float32)
    pos = scores[:, None, :]
    neg = scores[:, :, None]
    losses = jax.nn.relu(neg - pos + margin) * mask
    return jnp.sum(losses) / jnp.sum(mask)


if __name__ == "__main__":
    key = jax.random.PRNGKey(0)
    k1, k2, k3, k4 = jax.random.split(key, 4)

    # Small square case matching the torch module's broadcasting contract.
    B = N = 8
    scores = jax.random.normal(k1, (B, N), dtype=jnp.float32)
    labels = jax.random.randint(k2, (B, N), 0, 3, dtype=jnp.int32)
    loss = jax.block_until_ready(pairwise_ranking_loss(scores, labels, margin=1.0))
    ref = jax.block_until_ready(_reference(scores, labels, margin=1.0))
    assert jnp.allclose(loss, ref, rtol=1e-4, atol=1e-5), (loss, ref)

    # Unaligned case exercising lane/row padding and multi-step accumulation.
    B2 = N2 = 20
    scores2 = jax.random.normal(k3, (B2, N2), dtype=jnp.float32)
    labels2 = jax.random.randint(k4, (B2, N2), 0, 4, dtype=jnp.int32)
    loss2 = jax.block_until_ready(
        pairwise_ranking_loss(scores2, labels2, margin=0.5, batch_tile=8))
    ref2 = jax.block_until_ready(_reference(scores2, labels2, margin=0.5))
    assert jnp.allclose(loss2, ref2, rtol=1e-4, atol=1e-5), (loss2, ref2)

    print("KERNEL_OK")
</pallas_src>

<mosaic_0001>
module attributes {stable_mosaic.version = 11 : i64} {
  func.func @_pairwise_ranking_loss_kernel(%arg0: i32, %arg1: i32, %arg2: memref<8x128xf32, #tpu.memory_space<vmem>>, %arg3: memref<8x128xi32, #tpu.memory_space<vmem>>, %arg4: memref<1x1x1xf32, #tpu.memory_space<vmem>>, %arg5: memref<1x1x1xf32, #tpu.memory_space<vmem>>, %arg6: memref<8x128xf32, #tpu.memory_space<vmem>>, %arg7: memref<8x128xf32, #tpu.memory_space<vmem>>) attributes {dimension_semantics = [#tpu.dimension_semantics<parallel>, #tpu.dimension_semantics<arbitrary>], iteration_bounds = array<i64: 1, 1>, scalar_prefetch = 0 : i64, scratch_operands = 2 : i64, tpu.core_type = #tpu.core_type<tc>, window_params = [{transform_indices = @transform_0, window_bounds = array<i64: 8, 128>}, {transform_indices = @transform_1, window_bounds = array<i64: 8, 128>}, {transform_indices = @transform_2, window_bounds = array<i64: 1, 1, 1>}, {transform_indices = @transform_3, window_bounds = array<i64: 1, 1, 1>}]} {
    %c0_i32 = arith.constant 0 : i32
    %0 = arith.cmpi eq, %arg1, %c0_i32 : i32
    %1 = arith.extui %0 : i1 to i32
    %c0_i32_0 = arith.constant 0 : i32
    %2 = arith.cmpi ne, %1, %c0_i32_0 : i32
    scf.if %2 {
      %cst_10 = arith.constant 0.000000e+00 : f32
      %24 = vector.broadcast %cst_10 : f32 to vector<8x128xf32>
      %c0_11 = arith.constant 0 : index
      %c0_12 = arith.constant 0 : index
      %25 = vector.load %arg6[%c0_11, %c0_12] : memref<8x128xf32, #tpu.memory_space<vmem>>, vector<8x128xf32>
      tpu.vector_store %arg6[%c0_11, %c0_12], %24 {strides = array<i32>} : memref<8x128xf32, #tpu.memory_space<vmem>>, vector<8x128xf32>,
      %cst_13 = arith.constant 0.000000e+00 : f32
      %26 = vector.broadcast %cst_13 : f32 to vector<8x128xf32>
      %c0_14 = arith.constant 0 : index
      %c0_15 = arith.constant 0 : index
      %27 = vector.load %arg7[%c0_14, %c0_15] : memref<8x128xf32, #tpu.memory_space<vmem>>, vector<8x128xf32>
      tpu.vector_store %arg7[%c0_14, %c0_15], %26 {strides = array<i32>} : memref<8x128xf32, #tpu.memory_space<vmem>>, vector<8x128xf32>,
    } else {
    }
    %c0 = arith.constant 0 : index
    %c0_1 = arith.constant 0 : index
    %3 = vector.load %arg2[%c0, %c0_1] : memref<8x128xf32, #tpu.memory_space<vmem>>, vector<8x128xf32>
    %c0_2 = arith.constant 0 : index
    %c0_3 = arith.constant 0 : index
    %4 = vector.load %arg3[%c0_2, %c0_3] : memref<8x128xi32, #tpu.memory_space<vmem>>, vector<8x128xi32>
    %cst = arith.constant 1.000000e+00 : f32
    %5 = vector.broadcast %cst : f32 to vector<8x128xf32>
    %6 = arith.addf %3, %5 : vector<8x128xf32>
    %c1_i32 = arith.constant 1 : i32
    %7 = arith.muli %arg0, %c1_i32 : i32
    %8 = arith.addi %7, %arg1 : i32
    %c8_i32 = arith.constant 8 : i32
    %9 = arith.muli %8, %c8_i32 : i32
    %10 = tpu.iota {dimensions = array<i32: 0>} : vector<8x128xi32>
    %11 = vector.broadcast %9 : i32 to vector<8x128xi32>
    %12 = arith.addi %10, %11 : vector<8x128xi32>
    %13 = tpu.iota {dimensions = array<i32: 1>} : vector<8x128xi32>
    %c8_i32_4 = arith.constant 8 : i32
    %14 = vector.broadcast %c8_i32_4 : i32 to vector<8x128xi32>
    %15 = arith.cmpi slt, %12, %14 : vector<8x128xi32>
    %c8_i32_5 = arith.constant 8 : i32
    %16 = vector.broadcast %c8_i32_5 : i32 to vector<8x128xi32>
    %17 = arith.cmpi slt, %13, %16 : vector<8x128xi32>
    %18 = arith.andi %15, %17 : vector<8x128xi1>
    %c0_i32_6 = arith.constant 0 : i32
    %c128_i32 = arith.constant 128 : i32
    %19 = arith.addi %c0_i32_6, %c128_i32 : i32
    %c1_i32_7 = arith.constant 1 : i32
    %20:3 = scf.for %arg8 = %c0_i32_6 to %19 step %c1_i32_7 iter_args(%arg9 = %3, %arg10 = %4, %arg11 = %13) -> (vector<8x128xf32>, vector<8x128xi32>, vector<8x128xi32>)  : i32 {
      %24 = arith.cmpi ne, %4, %arg10 : vector<8x128xi32>
      %25 = arith.andi %24, %18 : vector<8x128xi1>
      %c8_i32_10 = arith.constant 8 : i32
      %26 = vector.broadcast %c8_i32_10 : i32 to vector<8x128xi32>
      %27 = arith.cmpi slt, %arg11, %26 : vector<8x128xi32>
      %28 = arith.andi %25, %27 : vector<8x128xi1>
      %29 = arith.subf %6, %arg9 : vector<8x128xf32>
      %cst_11 = arith.constant 0.000000e+00 : f32
      %30 = vector.broadcast %cst_11 : f32 to vector<8x128xf32>
      %31 = arith.maximumf %29, %30 : vector<8x128xf32>
      %c0_12 = arith.constant 0 : index
      %c0_13 = arith.constant 0 : index
      %32 = vector.load %arg6[%c0_12, %c0_13] : memref<8x128xf32, #tpu.memory_space<vmem>>, vector<8x128xf32>
      %cst_14 = arith.constant 0.000000e+00 : f32
      %33 = vector.broadcast %cst_14 : f32 to vector<8x128xf32>
      %34 = arith.select %28, %31, %33 : vector<8x128xi1>, vector<8x128xf32>
      %35 = arith.addf %32, %34 : vector<8x128xf32>
      %c0_15 = arith.constant 0 : index
      %c0_16 = arith.constant 0 : index
      %36 = vector.load %arg6[%c0_15, %c0_16] : memref<8x128xf32, #tpu.memory_space<vmem>>, vector<8x128xf32>
      tpu.vector_store %arg6[%c0_15, %c0_16], %35 {strides = array<i32>} : memref<8x128xf32, #tpu.memory_space<vmem>>, vector<8x128xf32>,
      %c0_17 = arith.constant 0 : index
      %c0_18 = arith.constant 0 : index
      %37 = vector.load %arg7[%c0_17, %c0_18] : memref<8x128xf32, #tpu.memory_space<vmem>>, vector<8x128xf32>
      %38 = arith.extui %28 : vector<8x128xi1> to vector<8x128xi32>
      %39 = arith.sitofp %38 : vector<8x128xi32> to vector<8x128xf32>
      %40 = arith.addf %37, %39 : vector<8x128xf32>
      %c0_19 = arith.constant 0 : index
      %c0_20 = arith.constant 0 : index
      %41 = vector.load %arg7[%c0_19, %c0_20] : memref<8x128xf32, #tpu.memory_space<vmem>>, vector<8x128xf32>
      tpu.vector_store %arg7[%c0_19, %c0_20], %40 {strides = array<i32>} : memref<8x128xf32, #tpu.memory_space<vmem>>, vector<8x128xf32>,
      %c1_i32_21 = arith.constant 1 : i32
      %42 = tpu.dynamic_rotate %arg9 by %c1_i32_21 dim 1 : vector<8x128xf32>, i32 -> vector<8x128xf32>
      %c1_i32_22 = arith.constant 1 : i32
      %43 = tpu.dynamic_rotate %arg10 by %c1_i32_22 dim 1 : vector<8x128xi32>, i32 -> vector<8x128xi32>
      %c1_i32_23 = arith.constant 1 : i32
      %44 = tpu.dynamic_rotate %arg11 by %c1_i32_23 dim 1 : vector<8x128xi32>, i32 -> vector<8x128xi32>
      scf.yield %42, %43, %44 : vector<8x128xf32>, vector<8x128xi32>, vector<8x128xi32>
    }
    %c0_i32_8 = arith.constant 0 : i32
    %21 = arith.cmpi eq, %arg1, %c0_i32_8 : i32
    %22 = arith.extui %21 : i1 to i32
    %c0_i32_9 = arith.constant 0 : i32
    %23 = arith.cmpi ne, %22, %c0_i32_9 : i32
    scf.if %23 {
      %c0_10 = arith.constant 0 : index
      %c0_11 = arith.constant 0 : index
      %24 = vector.load %arg6[%c0_10, %c0_11] : memref<8x128xf32, #tpu.memory_space<vmem>>, vector<8x128xf32>
      %25 = vector.shape_cast %24 : vector<8x128xf32> to vector<1x8x128xf32>
      %cst_12 = arith.constant dense<0.000000e+00> : vector<1xf32>
      %26 = vector.multi_reduction <add>, %25, %cst_12 [1, 2] : vector<1x8x128xf32> to vector<1xf32>
      %27 = vector.shape_cast %26 : vector<1xf32> to vector<1x1x1xf32>
      %28 = vector.extract %27[0, 0, 0] : f32 from vector<1x1x1xf32>
      %29 = vector.broadcast %28 : f32 to vector<1x1x1xf32>
      %c0_13 = arith.constant 0 : index
      %c0_14 = arith.constant 0 : index
      %c0_15 = arith.constant 0 : index
      %30 = vector.load %arg4[%c0_13, %c0_14, %c0_15] : memref<1x1x1xf32, #tpu.memory_space<vmem>>, vector<1x1x1xf32>
      tpu.vector_store %arg4[%c0_13, %c0_14, %c0_15], %29 {strides = array<i32>} : memref<1x1x1xf32, #tpu.memory_space<vmem>>, vector<1x1x1xf32>,
      %c0_16 = arith.constant 0 : index
      %c0_17 = arith.constant 0 : index
      %31 = vector.load %arg7[%c0_16, %c0_17] : memref<8x128xf32, #tpu.memory_space<vmem>>, vector<8x128xf32>
      %32 = vector.shape_cast %31 : vector<8x128xf32> to vector<1x8x128xf32>
      %cst_18 = arith.constant dense<0.000000e+00> : vector<1xf32>
      %33 = vector.multi_reduction <add>, %32, %cst_18 [1, 2] : vector<1x8x128xf32> to vector<1xf32>
      %34 = vector.shape_cast %33 : vector<1xf32> to vector<1x1x1xf32>
      %35 = vector.extract %34[0, 0, 0] : f32 from vector<1x1x1xf32>
      %36 = vector.broadcast %35 : f32 to vector<1x1x1xf32>
      %c0_19 = arith.constant 0 : index
      %c0_20 = arith.constant 0 : index
      %c0_21 = arith.constant 0 : index
      %37 = vector.load %arg5[%c0_19, %c0_20, %c0_21] : memref<1x1x1xf32, #tpu.memory_space<vmem>>, vector<1x1x1xf32>
      tpu.vector_store %arg5[%c0_19, %c0_20, %c0_21], %36 {strides = array<i32>} : memref<1x1x1xf32, #tpu.memory_space<vmem>>, vector<1x1x1xf32>,
    } else {
    }
    return
  }
  func.func @transform_0(%arg0: i32, %arg1: i32) -> (i32, i32) {
    %c1_i32 = arith.constant 1 : i32
    %0 = arith.muli %arg0, %c1_i32 : i32
    %1 = arith.addi %0, %arg1 : i32
    %c0_i32 = arith.constant 0 : i32
    %c0_i32_0 = arith.constant 0 : i32
    return %1, %c0_i32 : i32, i32
  }
  func.func @transform_1(%arg0: i32, %arg1: i32) -> (i32, i32) {
    %c1_i32 = arith.constant 1 : i32
    %0 = arith.muli %arg0, %c1_i32 : i32
    %1 = arith.addi %0, %arg1 : i32
    %c0_i32 = arith.constant 0 : i32
    %c0_i32_0 = arith.constant 0 : i32
    return %1, %c0_i32 : i32, i32
  }
  func.func @transform_2(%arg0: i32, %arg1: i32) -> (i32, i32, i32) {
    %c0_i32 = arith.constant 0 : i32
    %c0_i32_0 = arith.constant 0 : i32
    %c0_i32_1 = arith.constant 0 : i32
    return %arg0, %c0_i32, %c0_i32_0 : i32, i32, i32
  }
  func.func @transform_3(%arg0: i32, %arg1: i32) -> (i32, i32, i32) {
    %c0_i32 = arith.constant 0 : i32
    %c0_i32_0 = arith.constant 0 : i32
    %c0_i32_1 = arith.constant 0 : i32
    return %arg0, %c0_i32, %c0_i32_0 : i32, i32, i32
  }
}

</mosaic_0001>

<bundles_post_ra>
// kernel: tpu_custom_call.1
= control target key start
LH: loop header
LB: loop body
LE: loop exit
PB: predicated region body
PF: predicated region fallthrough
CT: control target
= control target key end

     0   :  { %9 = vsyncpa [#allocation5], 0  ;;  %s380_s0 = inlined_call_operand.hbm [shape: f32[8,128], index: 0, kind: input, shape index: {}]   ;;  %s381_s1 = inlined_call_operand.hbm [shape: s32[8,128], index: 1, kind: input, shape index: {}]   ;;  %s382_s2 = inlined_call_operand.hbm [shape: f32[1,1,1], index: 2, kind: output, shape index: {0}]   ;;  %s383_s3 = inlined_call_operand.hbm [shape: f32[1,1,1], index: 3, kind: output, shape index: {1}]  }
   0x1   :  { %10 = vsyncpa [#allocation8], 0 }
   0x2   :  { %11 = vsyncpa [#allocation6], 0 }
   0x3   :  { %12 = vsyncpa [#allocation11], 0  ;;  %s333_s12 = smov [#allocation4]   ;;  %s334_s14 = smov [#allocation7]  }
   0x4   :  { %s22_s13 = sshll.u32 %s333_s12, 4  ;;  %s35_s15 = sshll.u32 %s334_s14, 4  ;;  %s23_s13 = int_to_ptr.vmem [resolvable:$true] %s22_s13  ;;  %s36_s15 = int_to_ptr.vmem [resolvable:$true] %s35_s15 }
   0x5   :  { %s221_s16 = scalar_lea.vmem %s23_s13, 128  ;;  %p226_p1 = scmp.lt.s32.totalorder %s23_s13, %s23_s13 }
   0x6   :  { %p222_p0 = scmp.ne.s32.totalorder %s23_s13, %s221_s16  ;;  %p227_p2 = scmp.lt.s32.totalorder %s221_s16, %s221_s16 }
   0x8   :  { %p228_p3 = por %p227_p2, %p226_p1 }
   0xa   :  { %p229_p4 = pnand %p228_p3, %p222_p0 }
   0xc   :  { %232 = shalt.err (!%p229_p4)
}
   0xd   :  { %25 = dma.hbm_to_vmem [thread:$0]  %s380_s0, 128, %s23_s13, [#allocation5]  }
   0xe   :  { %s241_s19 = scalar_lea.vmem %s36_s15, 128  ;;  %p246_p6 = scmp.lt.s32.totalorder %s36_s15, %s36_s15 }
   0xf   :  { %p242_p5 = scmp.ne.s32.totalorder %s36_s15, %s241_s19  ;;  %p247_p7 = scmp.lt.s32.totalorder %s241_s19, %s241_s19 }
  0x11   :  { %p248_p8 = por %p247_p7, %p246_p6 }
  0x13   :  { %p249_p9 = pnand %p248_p8, %p242_p5 }
  0x15   :  { %252 = shalt.err (!%p249_p9)
}
  0x16   :  { %38 = dma.hbm_to_vmem [thread:$0]  %s381_s1, 128, %s36_s15, [#allocation8]  }
  0x17   :  { %309 = dma.done.wait [#allocation5], 128  }
  0x18   :  { %310 = vsyncadd [#allocation5], 4294967168 }
  0x19   :  { %311 = dma.done.wait [#allocation8], 128  }
  0x1a   :  { %312 = vsyncadd [#allocation8], 4294967168  ;;  %v62_v0 = vlaneseq  ;;  %v335_v1 = vmov 0.0   ;;  %v53_v3 = vld [vmem:[#allocation4] sm:$0xff]   ;;  %v54_v4 = vld [vmem:[#allocation7] sm:$0xff]   ;;  %s366_s0 = smov 0  }
  0x1b   :  { %51 = vst [vmem:[#allocation2] sm:$0xff] %v335_v1  ;;  %52 = vst [vmem:[#allocation3] sm:$0xff] %v335_v1  ;;  %v55_v5 = vadd.f32 1.0, %v53_v3  ;;  %v321_v7 = vmov %v54_v4   ;;  %v325_v8 = vmov %v53_v3  }
  0x1c   :  { %v63_v2 = vand.u32 127, %v62_v0  }
  0x1e   :  { %vm65_vm0 = vcmp.lt.s32.totalorder %v63_v2, 8  ;;  %v317_v6 = vmov %v63_v2  }
  0x1f LB: > { %s336_s1 = smov 1   ;;  %v80_v9 = vsub.f32 %v55_v5, %v327_v8  ;;  %vm76_vm1 = vcmp.ne.s32.totalorder %v54_v4, %v323_v7  ;;  %vm78_vm2 = vcmp.lt.s32.totalorder %v319_v6, 8  ;;  %v337_v13 = vmov 0.0   ;;  %s72_s0 = sadd.s32 1, %s331_s0   ;;  %s331_s0 = sphi %s366_s0, %s72_s0   ;;  %v327_v8 = vphi %v325_v8, %v92_v8   ;;  %v323_v7 = vphi %v321_v7, %v94_v7   ;;  %v319_v6 = vphi %v317_v6, %v96_v6  }
  0x20   : > { %91 = vrot.lane.b32.xlu0 %v327_v8, %s336_s1  ;;  %95 = vrot.lane.b32.xlu1 %v319_v6, %s336_s1  ;;  %vm77_vm3 = vmand %vm76_vm1, %vm65_vm0  ;;  %p69_p10 = scmp.ge.s32.totalorder %s72_s0, 128  }
  0x21   : > { %v81_v11 = vmax.f32 %v80_v9, 0.0  ;;  %vm79_vm4 = vmand %vm77_vm3, %vm78_vm2  ;;  %s338_s22 = smov (%p69_p10), [#allocation9]   ;;  %vm111_vm5 = vcmask (%p69_p10), 0   ;;  %s339_s25 = smov (%p69_p10), [#allocation10]  }
  0x22   : > { %v86_v10 = vld [vmem:[#allocation3] sm:$0xff]  ;;  %v82_v12 = vld [vmem:[#allocation2] sm:$0xff]  ;;  %v169_v14 = vsel %vm79_vm4, 1.0, %v337_v13  ;;  %s131_s23 = sshll.u32 (%p69_p10), %s338_s22, 4  ;;  %s141_s26 = sshll.u32 (%p69_p10), %s339_s25, 4  ;;  %s132_s23 = int_to_ptr.vmem [resolvable:$true] %s131_s23  ;;  %s142_s26 = int_to_ptr.vmem [resolvable:$true] %s141_s26 }
  0x23   : > { %v83_v15 = vsel %vm79_vm4, %v81_v11, 0.0  ;;  %v89_v16 = vadd.f32 %v169_v14, %v86_v10  ;;  %s253_s27 = scalar_lea.vmem (%p69_p10), %s132_s23, 16  ;;  %s257_s28 = scalar_lea.vmem (%p69_p10), %s132_s23, 32 }
  0x24   : > { %93 = vrot.lane.b32.xlu0 %v323_v7, %s336_s1  ;;  %v84_v17 = vadd.f32 %v83_v15, %v82_v12  ;;  %p254_p11 = scmp.ne.s32.totalorder (%p69_p10), %s132_s23, %s253_s27  ;;  %p258_p12 = scmp.lt.s32.totalorder (%p69_p10), %s132_s23, %s132_s23 }
  0x25   : > { %90 = vst [vmem:[#allocation3] sm:$0xff] %v89_v16  ;;  %p259_p13 = scmp.lt.s32.totalorder (%p69_p10), %s257_s28, %s253_s27 }
  0x26   : > { %85 = vst [vmem:[#allocation2] sm:$0xff] %v84_v17 }
  0x27   :  { %p260_p0 = por (%p69_p10), %p259_p13, %p258_p12 }
  0x29   :  { %p261_p1 = pnand (%p69_p10), %p260_p0, %p254_p11 }
  0x2c   :  { %v113_v19 = vld [vmem:[#allocation3] sm:$0xff] (%p69_p10) }
  0x2d   :  { %v100_v18 = vld [vmem:[#allocation2] sm:$0xff] (%p69_p10) }
  0x43   :  { %101 = vadd.xlane.f32.xlu0 (%p69_p10), %v100_v18 }
  0x47   :  { %114 = vadd.xlane.f32.xlu0 (%p69_p10), %v113_v19 }
  0x92   : > { %v92_v8 = vpop.permute.xlu0 %91   ;;  %v96_v6 = vpop.permute.xlu1 %95   ;;  %71 = sbr.rel (!%p69_p10) target bundleno = 31 (0x1f), region = 61 }
  0x96   : > { %v94_v7 = vpop.permute.xlu0 %93  }
  0xcc   :  { %v102_v20 = vpop.xlane.xlu0 %101 }
  0xcd   :  { %v103_v21 = vrot.slane %v102_v20, 4 }
  0xcf   :  { %v104_v22 = vadd.f32 %v103_v21, %v102_v20 }
  0xd0   :  { %v115_v23 = vpop.xlane.xlu0 %114 }
  0xd1   :  { %v105_v24 = vrot.slane %v104_v22, 2  ;;  %v116_v25 = vrot.slane %v115_v23, 4 }
  0xd3   :  { %v117_v26 = vadd.f32 %v116_v25, %v115_v23  ;;  %v106_v27 = vadd.f32 %v105_v24, %v104_v22 }
  0xd5   :  { %v118_v28 = vrot.slane %v117_v26, 2  ;;  %v107_v29 = vrot.slane %v106_v27, 1 }
  0xd7   :  { %v119_v30 = vadd.f32 %v118_v28, %v117_v26  ;;  %v108_v31 = vadd.f32 %v107_v29, %v106_v27 }
  0xd9   :  { %170 = vpush %v108_v31  ;;  %v120_v32 = vrot.slane %v119_v30, 1 }
  0xdb   :  { %v121_v33 = vadd.f32 %v120_v32, %v119_v30 }
  0xdd   :  { %172 = vpush %v121_v33 }
 0x10a   :  { %s171_s24 = spop %170 }
 0x10b   :  { %v110_v34 = vstv %s171_s24 }
 0x10c   :  { %112 = vst.msk [vmem:[#allocation9] sm:$0x1] %vm111_vm5, %v110_v34 }
 0x10d   :  { %264 = shalt.err (!%p261_p1)
}
 0x10e   :  { %134 = dma.vmem_to_hbm [thread:$0]  %s132_s23, 16, %s382_s2, [#allocation6]  }
 0x10f   :  { %s173_s4 = spop %172  ;;  %s273_s5 = scalar_lea.vmem %s142_s26, 16 }
 0x110   :  { %v123_v35 = vstv %s173_s4  ;;  %p274_p2 = scmp.ne.s32.totalorder %s142_s26, %s273_s5  ;;  %s277_s6 = scalar_lea.vmem %s142_s26, 32 }
 0x111   :  { %124 = vst.msk [vmem:[#allocation10] sm:$0x1] %vm111_vm5, %v123_v35  ;;  %p278_p3 = scmp.lt.s32.totalorder %s142_s26, %s142_s26  ;;  %p279_p4 = scmp.lt.s32.totalorder %s277_s6, %s273_s5 }
 0x113   :  { %p280_p5 = por %p279_p4, %p278_p3 }
 0x115   :  { %p281_p6 = pnand %p280_p5, %p274_p2 }
 0x117   :  { %284 = shalt.err (!%p281_p6)
}
 0x118   :  { %144 = dma.vmem_to_hbm [thread:$0]  %s142_s26, 16, %s383_s3, [#allocation11]  }
 0x119   :  { %313 = dma.done.wait [#allocation6], 16  }
 0x11a   :  { %314 = vsyncadd [#allocation6], 4294967280 }
 0x11b   :  { %315 = dma.done.wait [#allocation11], 16  }
 0x11c   :  { %316 = vsyncadd [#allocation11], 4294967280 }
 0x11d   :  { %151 = vsyncpa [#allocation5], 1 }
 0x11e   :  { %152 = vsyncpa [#allocation8], 1 }
 0x11f   :  { %153 = vsyncpa [#allocation6], 1 }
 0x120   :  { %154 = vsyncpa [#allocation11], 1 }

</bundles_post_ra>
